<compile_context>
chip_gen: v5e
topology: v5e:2x2
jax: 0.10.0
libtpu: 0.0.40
codegen_flags: <defaults>
</compile_context>

<pallas_src>
import functools

import jax
import jax.numpy as jnp
from jax.experimental import pallas as pl
from jax.experimental.pallas import tpu as pltpu


def _attention_kernel(x_ref, w_ref, b_ref, o_ref, *, step_dim, features_dim):
    # x_ref: (TB, S*F)  lane-dense block of flattened batch rows
    # w_ref: (1, S*F)   weight W tiled S times (w[s*F + f] == W[f])
    # b_ref: (1, S*F)   bias pre-expanded: b[s] at lane s*F, 0 elsewhere
    # o_ref: (TB, F)
    S, F = step_dim, features_dim
    L = S * F
    TB = x_ref.shape[0]

    x = x_ref[...]                      # (TB, L) f32
    w = w_ref[...]                      # (1, L)
    b_pre = b_ref[...]                  # (1, L)

    xw = x * w                          # (TB, L)  VPU, w broadcasts over sublanes

    # ---- Phase 1: within-segment dot products ------------------------------
    # Descending shift-add tree (shifts F/2, F/4, ..., 1).  Each level is one
    # offset-k lane slice (a single rotate) plus a VPU add.  Afterwards
    # t[:, s*F] == sum_f x[:, s*F + f] * W[f]; other lanes hold finite garbage.
    t = xw
    width = L
    k = F // 2
    while k >= 1:
        width -= k
        t = t[:, :width] + t[:, k:width + k]
        k //= 2
    # width == L - F + 1

    e = jnp.exp(jnp.tanh(t + b_pre[:, :width]))          # EUP transcendentals

    lane = jax.lax.broadcasted_iota(jnp.int32, (1, width), 1)
    m = jnp.where(lane % F == 0, e, 0.0)                 # keep segment-start lanes

    # Exact denominator (review: no approx reciprocal).
    denom = jnp.sum(m, axis=-1, keepdims=True) + 1e-7    # (TB, 1)

    # ---- Phase 2: broadcast each segment weight over its F lanes ------------
    # Ascending shift-add tree over the zero-masked tensor; since only the
    # segment-start lanes are non-zero, the fold is an exact within-segment
    # broadcast (no packing to (TB, S), no per-segment lane broadcasts).
    mb = jnp.concatenate(
        [m, jnp.zeros((TB, L - width), dtype=x.dtype)], axis=1)   # (TB, L)
    k = 1
    while k < F:
        shifted = jnp.concatenate(
            [jnp.zeros((TB, k), dtype=x.dtype), mb[:, :L - k]], axis=1)
        mb = mb + shifted
        k *= 2
    # mb[:, s*F + f] == exp(tanh(eij_s + b_s)) for every f

    # ---- Weighted sum over the step axis: aligned halving folds -------------
    y = mb * x                                           # (TB, L)
    width = L
    while width > F:
        half = width // 2
        y = y[:, :half] + y[:, half:width]
        width = half
    # y[:, f] == sum_s exp(tanh(...)) * x[:, s, f]

    o_ref[...] = (y / denom).astype(o_ref.dtype)         # exact division


def attention_forward(x, weight, b, *, block_b=2048):
    """x: (B, S, F) f32, weight: (F, 1), b: (S, 1) -> (B, F) f32."""
    B, S, F = x.shape
    assert S & (S - 1) == 0 and F & (F - 1) == 0, (
        "step_dim and features_dim must be powers of two for the fold trees")

    x = x.astype(jnp.float32)
    L = S * F

    # Lane-dense flattening (free, row-major): x_flat[r, s*F + f] == x[r, s, f].
    x_flat = x.reshape(B, L)
    # Weight tiled to match the flat layout.
    w_tiled = jnp.tile(weight.astype(jnp.float32).reshape(1, F), (1, S))   # (1, L)
    # Bias pre-expanded to lane s*F (zeros elsewhere) -- review suggestion.
    b_pre = jnp.pad(b.astype(jnp.float32).reshape(S, 1),
                    ((0, 0), (0, F - 1))).reshape(1, L)                    # (1, L)

    # Batch tiling: never split a batch that fits one block (single-TC v5e/v6e
    # would just pay extra grid-step overhead); big batches use TB = block_b.
    if B > block_b:
        TB = max(8, (block_b // 8) * 8)
        n_blocks = -(-B // TB)
        Bp = n_blocks * TB
        if Bp != B:
            # Zero-padded rows stay finite (tanh/exp) and are sliced off below.
            x_flat = jnp.pad(x_flat, ((0, Bp - B), (0, 0)))
    else:
        TB = B
        n_blocks = 1
        Bp = B

    cost = pl.CostEstimate(
        flops=6 * B * S * F,
        transcendentals=2 * B * S,
        bytes_accessed=B * L * 4 + B * F * 4 + 2 * L * 4,
    )

    out = pl.pallas_call(
        functools.partial(_attention_kernel, step_dim=S, features_dim=F),
        out_shape=jax.ShapeDtypeStruct((Bp, F), jnp.float32),
        grid_spec=pltpu.PrefetchScalarGridSpec(
            num_scalar_prefetch=0,
            grid=(n_blocks,),
            in_specs=[
                pl.BlockSpec((TB, L), lambda i: (i, 0)),   # x block (lane-dense)
                pl.BlockSpec((1, L), lambda i: (0, 0)),    # tiled weight (shared)
                pl.BlockSpec((1, L), lambda i: (0, 0)),    # pre-expanded bias
            ],
            out_specs=pl.BlockSpec((TB, F), lambda i: (i, 0)),
        ),
        compiler_params=pltpu.CompilerParams(
            dimension_semantics=("parallel",),
            # Explicit limit so TB=2048 blocks also fit under v5e's smaller
            # scoped-VMEM default (review: avoid a silent VMEM-limit failure).
            vmem_limit_bytes=32 * 1024 * 1024,
        ),
        cost_estimate=cost,
    )(x_flat, w_tiled, b_pre)

    return out[:B]


def xavier_uniform(key, shape, dtype=jnp.float32):
    # torch.nn.init.xavier_uniform_ for a 2-D tensor (fan_in, fan_out) = shape
    fan_in, fan_out = shape[0], shape[1]
    bound = (6.0 / (fan_in + fan_out)) ** 0.5
    return jax.random.uniform(key, shape, dtype=dtype, minval=-bound, maxval=bound)


def attention_ref(x, weight, b):
    """Pure-JAX reference mirroring the PyTorch forward.

    eij is computed with an element-wise multiply + reduce (exact f32) instead
    of jnp.matmul so the check is not skewed by XLA's reduced default matmul
    precision on TPU.
    """
    B, S, F = x.shape
    w = weight.reshape(-1)                                  # (F,)
    bb = b.reshape(-1)                                      # (S,)
    eij = jnp.sum(x * w[None, None, :], axis=-1)            # (B, S) exact f32
    eij = jnp.exp(jnp.tanh(eij + bb[None, :]))
    a = eij / (jnp.sum(eij, axis=1, keepdims=True) + 1e-7)
    return jnp.sum(x * a[:, :, None], axis=1)               # (B, F)


if __name__ == "__main__":
    # Shapes consistent with the module: step_dim=8, features_dim=32.
    S, F = 8, 32
    key = jax.random.PRNGKey(0)
    kx, kw, kb, kx2 = jax.random.split(key, 4)

    weight = xavier_uniform(kw, (F, 1))   # Parameter(features_dim, 1)
    b = xavier_uniform(kb, (S, 1))        # Parameter(step_dim, 1)

    # Case 1: tiny batch (single grid step, TB == B).
    B = 2
    x = jax.random.normal(kx, (B, S, F), dtype=jnp.float32)
    out = jax.block_until_ready(attention_forward(x, weight, b))
    ref = attention_ref(x, weight, b)
    assert out.shape == (B, F)
    err = float(jnp.max(jnp.abs(out - ref)))
    assert jnp.allclose(out, ref, atol=1e-4, rtol=1e-3), (
        f"mismatch vs reference (B=2), max abs err {err}")

    # Case 2: larger batch, still a single block.
    B2 = 40
    x2 = jax.random.normal(kx2, (B2, S, F), dtype=jnp.float32)
    out2 = jax.block_until_ready(attention_forward(x2, weight, b))
    ref2 = attention_ref(x2, weight, b)
    assert out2.shape == (B2, F)
    err2 = float(jnp.max(jnp.abs(out2 - ref2)))
    assert jnp.allclose(out2, ref2, atol=1e-4, rtol=1e-3), (
        f"mismatch vs reference (B=40), max abs err {err2}")

    # Case 3: exercise the multi-block + batch-padding path (TB=16 -> grid=3).
    out3 = jax.block_until_ready(attention_forward(x2, weight, b, block_b=16))
    assert out3.shape == (B2, F)
    err3 = float(jnp.max(jnp.abs(out3 - ref2)))
    assert jnp.allclose(out3, ref2, atol=1e-4, rtol=1e-3), (
        f"mismatch vs reference (B=40, multi-block), max abs err {err3}")

    print("KERNEL_OK")
</pallas_src>

<mosaic_0001>
module attributes {stable_mosaic.version = 11 : i64} {
  func.func @_attention_kernel(%arg0: i32, %arg1: memref<2x256xf32, #tpu.memory_space<vmem>>, %arg2: memref<1x256xf32, #tpu.memory_space<vmem>>, %arg3: memref<1x256xf32, #tpu.memory_space<vmem>>, %arg4: memref<2x32xf32, #tpu.memory_space<vmem>>) attributes {dimension_semantics = [#tpu.dimension_semantics<parallel>], iteration_bounds = array<i64: 1>, scalar_prefetch = 0 : i64, scratch_operands = 0 : i64, tpu.core_type = #tpu.core_type<tc>, window_params = [{transform_indices = @transform_0, window_bounds = array<i64: 2, 256>}, {pipeline_mode = #tpu.pipeline_mode<synchronous>, transform_indices = @transform_1, window_bounds = array<i64: 1, 256>}, {pipeline_mode = #tpu.pipeline_mode<synchronous>, transform_indices = @transform_2, window_bounds = array<i64: 1, 256>}, {transform_indices = @transform_3, window_bounds = array<i64: 2, 32>}]} {
    %c0 = arith.constant 0 : index
    %c0_0 = arith.constant 0 : index
    %0 = vector.load %arg1[%c0, %c0_0] : memref<2x256xf32, #tpu.memory_space<vmem>>, vector<2x256xf32>
    %c0_1 = arith.constant 0 : index
    %c0_2 = arith.constant 0 : index
    %1 = vector.load %arg2[%c0_1, %c0_2] : memref<1x256xf32, #tpu.memory_space<vmem>>, vector<1x256xf32>
    %c0_3 = arith.constant 0 : index
    %c0_4 = arith.constant 0 : index
    %2 = vector.load %arg3[%c0_3, %c0_4] : memref<1x256xf32, #tpu.memory_space<vmem>>, vector<1x256xf32>
    %3 = vector.broadcast %1 : vector<1x256xf32> to vector<2x256xf32>
    %4 = arith.mulf %0, %3 : vector<2x256xf32>
    %5 = vector.extract_strided_slice %4 {offsets = [0, 0], sizes = [2, 240], strides = [1, 1]} : vector<2x256xf32> to vector<2x240xf32>
    %6 = vector.extract_strided_slice %4 {offsets = [0, 16], sizes = [2, 240], strides = [1, 1]} : vector<2x256xf32> to vector<2x240xf32>
    %7 = arith.addf %5, %6 : vector<2x240xf32>
    %8 = vector.extract_strided_slice %7 {offsets = [0, 0], sizes = [2, 232], strides = [1, 1]} : vector<2x240xf32> to vector<2x232xf32>
    %9 = vector.extract_strided_slice %7 {offsets = [0, 8], sizes = [2, 232], strides = [1, 1]} : vector<2x240xf32> to vector<2x232xf32>
    %10 = arith.addf %8, %9 : vector<2x232xf32>
    %11 = vector.extract_strided_slice %10 {offsets = [0, 0], sizes = [2, 228], strides = [1, 1]} : vector<2x232xf32> to vector<2x228xf32>
    %12 = vector.extract_strided_slice %10 {offsets = [0, 4], sizes = [2, 228], strides = [1, 1]} : vector<2x232xf32> to vector<2x228xf32>
    %13 = arith.addf %11, %12 : vector<2x228xf32>
    %14 = vector.extract_strided_slice %13 {offsets = [0, 0], sizes = [2, 226], strides = [1, 1]} : vector<2x228xf32> to vector<2x226xf32>
    %15 = vector.extract_strided_slice %13 {offsets = [0, 2], sizes = [2, 226], strides = [1, 1]} : vector<2x228xf32> to vector<2x226xf32>
    %16 = arith.addf %14, %15 : vector<2x226xf32>
    %17 = vector.extract_strided_slice %16 {offsets = [0, 0], sizes = [2, 225], strides = [1, 1]} : vector<2x226xf32> to vector<2x225xf32>
    %18 = vector.extract_strided_slice %16 {offsets = [0, 1], sizes = [2, 225], strides = [1, 1]} : vector<2x226xf32> to vector<2x225xf32>
    %19 = arith.addf %17, %18 : vector<2x225xf32>
    %20 = vector.extract_strided_slice %2 {offsets = [0, 0], sizes = [1, 225], strides = [1, 1]} : vector<1x256xf32> to vector<1x225xf32>
    %21 = vector.broadcast %20 : vector<1x225xf32> to vector<2x225xf32>
    %22 = arith.addf %19, %21 : vector<2x225xf32>
    %23 = math.tanh %22 : vector<2x225xf32>
    %24 = math.exp %23 : vector<2x225xf32>
    %25 = tpu.iota {dimensions = array<i32: 1>} : vector<1x225xi32>
    %c32_i32 = arith.constant 32 : i32
    %c0_i32 = arith.constant 0 : i32
    %26 = arith.cmpi eq, %c32_i32, %c0_i32 : i32
    %c1_i32 = arith.constant 1 : i32
    %27 = arith.select %26, %c1_i32, %c32_i32 : i32
    %28 = vector.broadcast %27 : i32 to vector<1x225xi32>
    %29 = arith.remsi %25, %28 : vector<1x225xi32>
    %c0_i32_5 = arith.constant 0 : i32
    %30 = vector.broadcast %c0_i32_5 : i32 to vector<1x225xi32>
    %31 = arith.cmpi ne, %29, %30 : vector<1x225xi32>
    %c0_i32_6 = arith.constant 0 : i32
    %32 = vector.broadcast %c0_i32_6 : i32 to vector<1x225xi32>
    %33 = arith.cmpi slt, %29, %32 : vector<1x225xi32>
    %c0_i32_7 = arith.constant 0 : i32
    %34 = arith.cmpi slt, %27, %c0_i32_7 : i32
    %35 = vector.broadcast %34 : i1 to vector<1x225xi1>
    %36 = vector.broadcast %35 : vector<1x225xi1> to vector<1x225xi1>
    %37 = arith.xori %33, %36 : vector<1x225xi1>
    %38 = arith.andi %37, %31 : vector<1x225xi1>
    %39 = vector.broadcast %27 : i32 to vector<1x225xi32>
    %40 = arith.addi %29, %39 : vector<1x225xi32>
    %41 = arith.select %38, %40, %29 : vector<1x225xi1>, vector<1x225xi32>
    %c0_i32_8 = arith.constant 0 : i32
    %42 = vector.broadcast %c0_i32_8 : i32 to vector<1x225xi32>
    %43 = arith.cmpi eq, %41, %42 : vector<1x225xi32>
    %cst = arith.constant 0.000000e+00 : f32
    %44 = vector.shape_cast %43 : vector<1x225xi1> to vector<1x225xi1>
    %45 = vector.broadcast %44 : vector<1x225xi1> to vector<2x225xi1>
    %46 = vector.broadcast %cst : f32 to vector<2x225xf32>
    %47 = arith.select %45, %24, %46 : vector<2x225xi1>, vector<2x225xf32>
    %cst_9 = arith.constant dense<0.000000e+00> : vector<2xf32>
    %48 = vector.multi_reduction <add>, %47, %cst_9 [1] : vector<2x225xf32> to vector<2xf32>
    %49 = vector.shape_cast %48 : vector<2xf32> to vector<2x1xf32>
    %cst_10 = arith.constant 1.000000e-07 : f32
    %50 = vector.broadcast %cst_10 : f32 to vector<2x1xf32>
    %51 = arith.addf %49, %50 : vector<2x1xf32>
    %cst_11 = arith.constant 0.000000e+00 : f32
    %52 = vector.broadcast %cst_11 : f32 to vector<2x31xf32>
    %53 = tpu.concatenate %47, %52 in 1 : vector<2x225xf32>, vector<2x31xf32> -> vector<2x256xf32>
    %cst_12 = arith.constant 0.000000e+00 : f32
    %54 = vector.broadcast %cst_12 : f32 to vector<2x1xf32>
    %55 = vector.extract_strided_slice %53 {offsets = [0, 0], sizes = [2, 255], strides = [1, 1]} : vector<2x256xf32> to vector<2x255xf32>
    %56 = tpu.concatenate %54, %55 in 1 : vector<2x1xf32>, vector<2x255xf32> -> vector<2x256xf32>
    %57 = arith.addf %53, %56 : vector<2x256xf32>
    %cst_13 = arith.constant 0.000000e+00 : f32
    %58 = vector.broadcast %cst_13 : f32 to vector<2x2xf32>
    %59 = vector.extract_strided_slice %57 {offsets = [0, 0], sizes = [2, 254], strides = [1, 1]} : vector<2x256xf32> to vector<2x254xf32>
    %60 = tpu.concatenate %58, %59 in 1 : vector<2x2xf32>, vector<2x254xf32> -> vector<2x256xf32>
    %61 = arith.addf %57, %60 : vector<2x256xf32>
    %cst_14 = arith.constant 0.000000e+00 : f32
    %62 = vector.broadcast %cst_14 : f32 to vector<2x4xf32>
    %63 = vector.extract_strided_slice %61 {offsets = [0, 0], sizes = [2, 252], strides = [1, 1]} : vector<2x256xf32> to vector<2x252xf32>
    %64 = tpu.concatenate %62, %63 in 1 : vector<2x4xf32>, vector<2x252xf32> -> vector<2x256xf32>
    %65 = arith.addf %61, %64 : vector<2x256xf32>
    %cst_15 = arith.constant 0.000000e+00 : f32
    %66 = vector.broadcast %cst_15 : f32 to vector<2x8xf32>
    %67 = vector.extract_strided_slice %65 {offsets = [0, 0], sizes = [2, 248], strides = [1, 1]} : vector<2x256xf32> to vector<2x248xf32>
    %68 = tpu.concatenate %66, %67 in 1 : vector<2x8xf32>, vector<2x248xf32> -> vector<2x256xf32>
    %69 = arith.addf %65, %68 : vector<2x256xf32>
    %cst_16 = arith.constant 0.000000e+00 : f32
    %70 = vector.broadcast %cst_16 : f32 to vector<2x16xf32>
    %71 = vector.extract_strided_slice %69 {offsets = [0, 0], sizes = [2, 240], strides = [1, 1]} : vector<2x256xf32> to vector<2x240xf32>
    %72 = tpu.concatenate %70, %71 in 1 : vector<2x16xf32>, vector<2x240xf32> -> vector<2x256xf32>
    %73 = arith.addf %69, %72 : vector<2x256xf32>
    %74 = arith.mulf %73, %0 : vector<2x256xf32>
    %75 = vector.extract_strided_slice %74 {offsets = [0, 0], sizes = [2, 128], strides = [1, 1]} : vector<2x256xf32> to vector<2x128xf32>
    %76 = vector.extract_strided_slice %74 {offsets = [0, 128], sizes = [2, 128], strides = [1, 1]} : vector<2x256xf32> to vector<2x128xf32>
    %77 = arith.addf %75, %76 : vector<2x128xf32>
    %78 = vector.extract_strided_slice %77 {offsets = [0, 0], sizes = [2, 64], strides = [1, 1]} : vector<2x128xf32> to vector<2x64xf32>
    %79 = vector.extract_strided_slice %77 {offsets = [0, 64], sizes = [2, 64], strides = [1, 1]} : vector<2x128xf32> to vector<2x64xf32>
    %80 = arith.addf %78, %79 : vector<2x64xf32>
    %81 = vector.extract_strided_slice %80 {offsets = [0, 0], sizes = [2, 32], strides = [1, 1]} : vector<2x64xf32> to vector<2x32xf32>
    %82 = vector.extract_strided_slice %80 {offsets = [0, 32], sizes = [2, 32], strides = [1, 1]} : vector<2x64xf32> to vector<2x32xf32>
    %83 = arith.addf %81, %82 : vector<2x32xf32>
    %84 = vector.broadcast %51 : vector<2x1xf32> to vector<2x32xf32>
    %85 = arith.divf %83, %84 : vector<2x32xf32>
    %c0_17 = arith.constant 0 : index
    %c0_18 = arith.constant 0 : index
    %86 = vector.load %arg4[%c0_17, %c0_18] : memref<2x32xf32, #tpu.memory_space<vmem>>, vector<2x32xf32>
    tpu.vector_store %arg4[%c0_17, %c0_18], %85 {strides = array<i32>} : memref<2x32xf32, #tpu.memory_space<vmem>>, vector<2x32xf32>,
    return
  }
  func.func @transform_0(%arg0: i32) -> (i32, i32) {
    %c0_i32 = arith.constant 0 : i32
    %c0_i32_0 = arith.constant 0 : i32
    return %arg0, %c0_i32 : i32, i32
  }
  func.func @transform_1(%arg0: i32) -> (i32, i32) {
    %c0_i32 = arith.constant 0 : i32
    %c0_i32_0 = arith.constant 0 : i32
    %c0_i32_1 = arith.constant 0 : i32
    return %c0_i32, %c0_i32_0 : i32, i32
  }
  func.func @transform_2(%arg0: i32) -> (i32, i32) {
    %c0_i32 = arith.constant 0 : i32
    %c0_i32_0 = arith.constant 0 : i32
    %c0_i32_1 = arith.constant 0 : i32
    return %c0_i32, %c0_i32_0 : i32, i32
  }
  func.func @transform_3(%arg0: i32) -> (i32, i32) {
    %c0_i32 = arith.constant 0 : i32
    %c0_i32_0 = arith.constant 0 : i32
    return %arg0, %c0_i32 : i32, i32
  }
}

</mosaic_0001>

<bundles_post_ra>
// kernel: tpu_custom_call.1
= control target key start
LH: loop header
LB: loop body
LE: loop exit
PB: predicated region body
PF: predicated region fallthrough
CT: control target
= control target key end

     0   :  { %8 = vsyncpa [#allocation3], 0  ;;  %s465_s0 = inlined_call_operand.hbm [shape: f32[2,256], index: 0, kind: input, shape index: {}]   ;;  %s466_s1 = inlined_call_operand.hbm [shape: f32[1,256], index: 1, kind: input, shape index: {}]   ;;  %s467_s2 = inlined_call_operand.hbm [shape: f32[1,256], index: 2, kind: input, shape index: {}]   ;;  %s468_s3 = inlined_call_operand.hbm [shape: f32[2,32], index: 3, kind: output, shape index: {}]  }
   0x1   :  { %9 = vsyncpa [#allocation6], 0  ;;  %s27_s14 = sshll.u32 %s466_s1, 4  ;;  %s28_s14 = int_to_ptr.hbm [resolvable:$true] %s27_s14 }
   0x2   :  { %10 = vsyncpa [#allocation4], 0  ;;  %s410_s15 = smov [#allocation5]   ;;  %s16_s19 = sshll.u32 %s465_s0, 4  ;;  %s17_s19 = int_to_ptr.hbm [resolvable:$true] %s16_s19 }
   0x3   :  { %s29_s16 = sshll.u32 %s410_s15, 4  ;;  %s411_s20 = smov [#allocation2]   ;;  %s30_s16 = int_to_ptr.vmem [resolvable:$true] %s29_s16 }
   0x4   :  { %32 = dma.hbm_to_vmem [thread:$0]  %s28_s14, 32, %s30_s16, [#allocation6]  }
   0x5   :  { %s18_s21 = sshll.u32 %s411_s20, 4  ;;  %s38_s24 = sshll.u32 %s467_s2, 4  ;;  %s19_s21 = int_to_ptr.vmem [resolvable:$true] %s18_s21  ;;  %s39_s24 = int_to_ptr.hbm [resolvable:$true] %s38_s24 }
   0x6   :  { %21 = dma.hbm_to_vmem [thread:$0]  %s17_s19, 64, %s19_s21, [#allocation3]  }
   0x7   :  { %s412_s1 = smov [#allocation7]  }
   0x8   :  { %s40_s25 = sshll.u32 %s412_s1, 4  ;;  %s41_s25 = int_to_ptr.vmem [resolvable:$true] %s40_s25 }
   0x9   :  { %43 = dma.hbm_to_vmem [thread:$0]  %s39_s24, 32, %s41_s25, [#allocation6]  }
   0xa   :  { %404 = dma.done.wait [#allocation3], 64  }
   0xb   :  { %405 = vsyncadd [#allocation3], 4294967232 }
   0xc   :  { %406 = dma.done.wait [#allocation6], 64  }
   0xd   :  { %407 = vsyncadd [#allocation6], 4294967232  ;;  %v57_v0 = vld [vmem:[#allocation5] sm:$0x3]  ;;  %vm63_vm0 = vcmask 1041408   ;;  %s413_s0 = smov 112   ;;  %v117_v33 = vlaneseq }
   0xe   :  { %v60_v1 = vperm.slane %v57_v0, 0  ;;  %v61_v2 = vperm.slane %v57_v0, 1  ;;  %v455_v3 = vld [vmem:[#allocation2] sm:$0xf]  ;;  %vm71_vm1 = vcmask 916480   ;;  %s414_s2 = smov 120  }
   0xf   :  { %vm79_vm2 = vcmask 982016   ;;  %s415_s26 = smov 124   ;;  %vm87_vm3 = vcmask 1014784   ;;  %s416_s27 = smov 126   ;;  %vm95_vm4 = vcmask 1031168   ;;  %vm103_vm5 = vcmask 1039360  }
  0x10   :  { %v62_v4 = vrot.slane %v61_v2, 6  ;;  %s417_s28 = smov 127   ;;  %v58_v23 = vld [vmem:[#allocation7] sm:$0x3]  ;;  %v118_v36 = vand.u32 127, %v117_v33  ;;  %vm165_vm8 = vcmask 793600  }
  0x11   :  { %v109_v24 = vperm.slane %v58_v23, 1  ;;  %v108_v25 = vperm.slane %v58_v23, 0  ;;  %s418_s29 = smov 1   ;;  %vm173_vm9 = vcmask 7168   ;;  %s419_s30 = smov 2   ;;  %vm186_vm10 = vcmask 15360  }
  0x12   :  { %v64_v5 = vsel %vm63_vm0, %v60_v1, %v62_v4  ;;  %v119_v37 = vadd.s32 128, %v118_v36  ;;  %v124_v39 = vand.u32 31, %v118_v36  ;;  %s420_s4 = smov 4   ;;  %vm199_vm11 = vcmask 31744   ;;  %s421_s5 = smov 8  }
  0x13   :  { %v66_v6 = vmul.f32 %v64_v5, %v455_v3  ;;  %v110_v26 = vrot.slane %v109_v24, 6  ;;  %vm212_vm12 = vcmask 64512   ;;  %s422_s6 = smov 16   ;;  %vm159_vm13 = vcmask 787456   ;;  %s423_s7 = smov 64  }
  0x14   :  { %v131_v40 = vand.u32 31, %v119_v37  ;;  %vm144_vm6 = vcmp.eq.s32.totalorder %v124_v39, 0  ;;  %vm225_vm14 = vcmask 130048   ;;  %s424_s8 = smov 96   ;;  %s425_s9 = smov [#allocation8]  }
  0x15   :  { %68 = vrot.lane.b32.xlu0 %v66_v6, %s413_s0  ;;  %v111_v29 = vsel %vm63_vm0, %v108_v25, %v110_v26  ;;  %s273_s10 = sshll.u32 %s425_s9, 4  ;;  %s275_s13 = sshll.u32 %s468_s3, 4  ;;  %s274_s10 = int_to_ptr.vmem [resolvable:$true] %s273_s10  ;;  %s276_s13 = int_to_ptr.hbm [resolvable:$true] %s275_s13 }
  0x16   :  { %vm145_vm7 = vcmp.eq.s32.totalorder %v131_v40, 0 }
  0x87   :  { %v69_v7 = vpop.permute.xlu0 %68 }
  0x88   :  { %v70_v8 = vrot.slane %v69_v7, 2 }
  0x8a   :  { %v72_v9 = vsel %vm71_vm1, %v69_v7, %v70_v8 }
  0x8b   :  { %v74_v10 = vadd.f32 %v72_v9, %v66_v6 }
  0x8d   :  { %76 = vrot.lane.b32.xlu0 %v74_v10, %s414_s2 }
  0xff   :  { %v77_v11 = vpop.permute.xlu0 %76 }
 0x100   :  { %v78_v12 = vrot.slane %v77_v11, 2 }
 0x102   :  { %v80_v13 = vsel %vm79_vm2, %v77_v11, %v78_v12 }
 0x103   :  { %v82_v14 = vadd.f32 %v80_v13, %v74_v10 }
 0x105   :  { %84 = vrot.lane.b32.xlu1 %v82_v14, %s415_s26 }
 0x177   :  { %v85_v15 = vpop.permute.xlu1 %84 }
 0x178   :  { %v86_v16 = vrot.slane %v85_v15, 2 }
 0x17a   :  { %v88_v17 = vsel %vm87_vm3, %v85_v15, %v86_v16  ;;  %vm266_vm3 = vcmask 254976  }
 0x17b   :  { %v90_v18 = vadd.f32 %v88_v17, %v82_v14 }
 0x17d   :  { %92 = vrot.lane.b32.xlu1 %v90_v18, %s416_s27 }
 0x1ef   :  { %v93_v19 = vpop.permute.xlu1 %92 }
 0x1f0   :  { %v94_v20 = vrot.slane %v93_v19, 2 }
 0x1f2   :  { %v96_v21 = vsel %vm95_vm4, %v93_v19, %v94_v20 }
 0x1f3   :  { %v98_v22 = vadd.f32 %v96_v21, %v90_v18 }
 0x1f5   :  { %100 = vrot.lane.b32.xlu2 %v98_v22, %s417_s28 }
 0x24f   :  { %v101_v27 = vpop.permute.xlu2 %100 }
 0x250   :  { %v102_v28 = vrot.slane %v101_v27, 2 }
 0x252   :  { %v104_v30 = vsel %vm103_vm5, %v101_v27, %v102_v28 }
 0x253   :  { %v106_v31 = vadd.f32 %v104_v30, %v98_v22 }
 0x255   :  { %v113_v32 = vadd.f32 %v111_v29, %v106_v31 }
 0x257   :  { %302 = vtanh.f32 %v113_v32 }
 0x25d   :  { %v303_v34 = vpop.eup %302 }
 0x25e   :  { %v115_v35 = vmul.f32 1.442695, %v303_v34 }
 0x260   :  { %304 = vpow2.f32 %v115_v35 }
 0x266   :  { %v305_v38 = vpop.eup %304 }
 0x267   :  { %151 = vst [vmem:[#allocation1] ss:$4 sm:$0xff] %v305_v38 }
 0x26e   :  { %v152_v41 = vld.sshfl [vmem:[#allocation1] sm:$0xff pattern:$0x73625140]  ;;  %v153_v42 = vld.sshfl [vmem:[#allocation1 + $0x8] sm:$0xff pattern:$0x73625140] }
 0x26f   :  { %v156_v43 = vsel %vm144_vm6, %v152_v41, 0.0  ;;  %v157_v44 = vsel %vm145_vm7, %v153_v42, 0.0  ;;  %233 = vst [vmem:[#allocation1] ss:$4 sm:$0xff] %v455_v3 }
 0x270   :  { %169 = vrot.lane.b32.xlu2 %v156_v43, %s418_s29  ;;  %v166_v45 = vsel %vm165_vm8, %v157_v44, 0.0  ;;  %v158_v6 = vsel %vm63_vm0, %v156_v43, 0.0  ;;  %v160_v7 = vsel %vm159_vm13, %v157_v44, 0.0 }
 0x271   :  { %171 = vrot.lane.b32.xlu0 %v166_v45, %s418_s29  ;;  %v161_v8 = vadd.f32 %v160_v7, %v158_v6 }
 0x276   :  { %v234_v10 = vld.sshfl [vmem:[#allocation1] sm:$0xff pattern:$0x73625140]  ;;  %v235_v14 = vld.sshfl [vmem:[#allocation1 + $0x8] sm:$0xff pattern:$0x73625140] }
 0x2ca   :  { %v170_v46 = vpop.permute.xlu2 %169 }
 0x2cb   :  { %v177_v47 = vsel %vm173_vm9, 0.0, %v170_v46 }
 0x2cc   :  { %v178_v48 = vadd.f32 %v177_v47, %v156_v43 }
 0x2ce   :  { %182 = vrot.lane.b32.xlu1 %v178_v48, %s419_s30 }
 0x2e3   :  { %v172_v49 = vpop.permute.xlu0 %171 }
 0x2e4   :  { %v174_v50 = vsel %vm173_vm9, %v170_v46, %v172_v49 }
 0x2e5   :  { %v179_v51 = vadd.f32 %v174_v50, %v166_v45 }
 0x2e7   :  { %184 = vrot.lane.b32.xlu2 %v179_v51, %s419_s30 }
 0x340   :  { %v183_v52 = vpop.permute.xlu1 %182 }
 0x341   :  { %v190_v53 = vsel %vm186_vm10, 0.0, %v183_v52  ;;  %v185_v54 = vpop.permute.xlu2 %184 }
 0x342   :  { %v191_v55 = vadd.f32 %v190_v53, %v178_v48  ;;  %v187_v56 = vsel %vm186_vm10, %v183_v52, %v185_v54 }
 0x343   :  { %v192_v57 = vadd.f32 %v187_v56, %v179_v51 }
 0x344   :  { %195 = vrot.lane.b32.xlu0 %v191_v55, %s420_s4 }
 0x345   :  { %197 = vrot.lane.b32.xlu1 %v192_v57, %s420_s4 }
 0x3b6   :  { %v196_v58 = vpop.permute.xlu0 %195 }
 0x3b7   :  { %v203_v59 = vsel %vm199_vm11, 0.0, %v196_v58  ;;  %v198_v60 = vpop.permute.xlu1 %197 }
 0x3b8   :  { %v204_v61 = vadd.f32 %v203_v59, %v191_v55  ;;  %v200_v62 = vsel %vm199_vm11, %v196_v58, %v198_v60 }
 0x3b9   :  { %v205_v63 = vadd.f32 %v200_v62, %v192_v57 }
 0x3ba   :  { %208 = vrot.lane.b32.xlu2 %v204_v61, %s421_s5 }
 0x3bb   :  { %210 = vrot.lane.b32.xlu0 %v205_v63, %s421_s5 }
 0x414   :  { %v209_v0 = vpop.permute.xlu2 %208 }
 0x415   :  { %v216_v1 = vsel %vm212_vm12, 0.0, %v209_v0 }
 0x416   :  { %v217_v2 = vadd.f32 %v216_v1, %v204_v61 }
 0x418   :  { %221 = vrot.lane.b32.xlu1 %v217_v2, %s422_s6 }
 0x42d   :  { %v211_v3 = vpop.permute.xlu0 %210 }
 0x42e   :  { %v213_v4 = vsel %vm212_vm12, %v209_v0, %v211_v3 }
 0x42f   :  { %v218_v5 = vadd.f32 %v213_v4, %v205_v63 }
 0x431   :  { %223 = vrot.lane.b32.xlu2 %v218_v5, %s422_s6 }
 0x442   :  { %162 = vadd.xlane.f32.xlu1 %v161_v8 }
 0x48a   :  { %v222_v9 = vpop.permute.xlu1 %221 }
 0x48b   :  { %v229_v11 = vsel %vm225_vm14, 0.0, %v222_v9  ;;  %v224_v12 = vpop.permute.xlu2 %223 }
 0x48c   :  { %v230_v13 = vadd.f32 %v229_v11, %v217_v2  ;;  %v226_v15 = vsel %vm225_vm14, %v222_v9, %v224_v12 }
 0x48d   :  { %v231_v16 = vadd.f32 %v226_v15, %v218_v5 }
 0x48e   :  { %v238_v17 = vmul.f32 %v234_v10, %v230_v13 }
 0x48f   :  { %v239_v18 = vmul.f32 %v235_v14, %v231_v16 }
 0x491   :  { %v240_v19 = vadd.f32 %v239_v18, %v238_v17 }
 0x493   :  { %242 = vrot.lane.b32.xlu0 %v240_v19, %s423_s7 }
 0x4b5   :  { %v163_v22 = vpop.xlane.xlu1 %162 }
 0x4b6   :  { %v164_v23 = vadd.f32 1e-07, %v163_v22 }
 0x4b8   :  { %306 = vrcp.f32 %v164_v23  ;;  %v262_v29 = vand.u32 2147483648, %v164_v23  ;;  %vm256_vm0 = vweird.f32 %v164_v23  ;;  %v260_v30 = vand.u32 2147483647, %v164_v23 }
 0x4ba   :  { %v263_v33 = vor.u32 1.1754944e-38, %v262_v29  ;;  %vm261_vm2 = vcmp.eq.f32.partialorder %v260_v30, 8.507059e+37 }
 0x4be   :  { %v307_v24 = vpop.eup %306 }
 0x4bf   :  { %v252_v25 = vmul.f32 %v307_v24, %v164_v23  ;;  %vm257_vm15 = vweird.f32 %v307_v24 }
 0x4c0   :  { %vm258_vm1 = vmor %vm256_vm0, %vm257_vm15 }
 0x4c1   :  { %v253_v26 = vsub.f32 1.0, %v252_v25 }
 0x4c3   :  { %v254_v27 = vmul.f32 %v307_v24, %v253_v26 }
 0x4c5   :  { %v255_v28 = vadd.f32 %v307_v24, %v254_v27 }
 0x4c7   :  { %v259_v31 = vsel %vm258_vm1, %v307_v24, %v255_v28 }
 0x4c8   :  { %v264_v35 = vsel %vm261_vm2, %v263_v33, %v259_v31 }
 0x505   :  { %v243_v20 = vpop.permute.xlu0 %242 }
 0x506   :  { %v245_v21 = vadd.f32 %v243_v20, %v240_v19 }
 0x508   :  { %247 = vrot.lane.b32.xlu2 %v245_v21, %s424_s8 }
 0x562   :  { %v248_v32 = vpop.permute.xlu2 %247 }
 0x563   :  { %v250_v34 = vadd.f32 %v248_v32, %v245_v21 }
 0x565   :  { %v265_v36 = vmul.f32 %v264_v35, %v250_v34 }
 0x567   :  { %267 = vst.msk [vmem:[#allocation8] sm:$0x3] %vm266_vm3, %v265_v36 }
 0x568   :  { %278 = dma.vmem_to_hbm [thread:$0]  %s274_s10, 32, %s276_s13, [#allocation4]  }
 0x569   :  { %408 = dma.done.wait [#allocation4], 32  }
 0x56a   :  { %409 = vsyncadd [#allocation4], 4294967264 }
 0x56b   :  { %283 = vsyncpa [#allocation3], 1 }
 0x56c   :  { %284 = vsyncpa [#allocation6], 1 }
 0x56d   :  { %285 = vsyncpa [#allocation4], 1 }

</bundles_post_ra>
